<compile_context>
chip_gen: v7x
topology: tpu7x:2x2x1
jax: 0.10.0
libtpu: 0.0.40
codegen_flags: <defaults>
</compile_context>

<pallas_src>
import functools

import jax
import jax.numpy as jnp
from jax import lax
from jax.experimental import pallas as pl
from jax.experimental.pallas import tpu as pltpu

BN_EPS = 0.001


def _round_up(x, m):
    return ((x + m - 1) // m) * m


def _fused_kernel(w_ref, x_ref, mask_ref, gamma_ref, beta_ref, o_ref, patch_ref,
                  *, taps, cin_p, tm, wp, inv_m_valid):
    # w_ref:     [Cout_p, K_p]    bf16  resident (same block every step)
    # x_ref:     [1, Cin_p, L]    bf16  flattened padded image i (halo slab)
    # mask_ref:  [1, TM]          f32   1.0 at valid output flat positions
    # gamma_ref: [Cout_p, 1]      f32
    # beta_ref:  [Cout_p, 1]      f32
    # o_ref:     [N, Cout_p, TM]  f32   VMEM-resident across the whole grid
    # patch_ref: [K_p, TM]        bf16  scratch: in-kernel im2col tile
    i = pl.program_id(0)

    # ---- in-kernel im2col: statically shifted slices of the halo slab ----
    for t, (di, dj) in enumerate(taps):
        d = di * wp + dj
        patch_ref[t * cin_p:(t + 1) * cin_p, :] = x_ref[0, :, d:d + tm]

    # ---- conv for this image: y^T = W @ patches (bf16 in, f32 acc, MXU) ----
    y = jnp.dot(w_ref[...], patch_ref[...], preferred_element_type=jnp.float32)
    o_ref[i] = y

    # ---- last step: BN batch stats + folded affine + ReLU, all in VMEM ----
    @pl.when(i == pl.num_programs(0) - 1)
    def _():
        yall = o_ref[...]                                    # [N, Cout_p, TM]
        m = mask_ref[...].reshape(1, 1, tm)                  # valid-position mask
        mean = jnp.sum(jnp.sum(yall * m, axis=0), axis=-1,
                       keepdims=True) * inv_m_valid          # [Cout_p, 1]
        diff = (yall - mean[None]) * m
        var = jnp.sum(jnp.sum(diff * diff, axis=0), axis=-1,
                      keepdims=True) * inv_m_valid           # [Cout_p, 1]
        scale = gamma_ref[...] * lax.rsqrt(var + BN_EPS)     # [Cout_p, 1]
        shift = beta_ref[...] - mean * scale                 # [Cout_p, 1]
        # One FMA + max per element; lane-dense (TM is a multiple of 128).
        o_ref[...] = jnp.maximum(yall * scale[None] + shift[None], 0.0)


@functools.partial(jax.jit, static_argnames=("stride", "padding"))
def basic_conv2d(x, weight, gamma, beta, *, stride=1, padding=1):
    """BasicConv2d forward. x: [N,Cin,H,W], weight: [Cout,Cin,KH,KW] -> NCHW."""
    n, cin, h, w = x.shape
    cout, _, kh, kw = weight.shape

    hp, wp = h + 2 * padding, w + 2 * padding
    ho = (hp - kh) // stride + 1
    wo = (wp - kw) // stride + 1
    hc = (ho - 1) * stride + 1            # rows of the stride-1 flat grid kept

    cin_p = _round_up(cin, 16)            # bf16 sublane packing (16 rows/vreg)
    cout_p = _round_up(cout, 16)
    k_p = kh * kw * cin_p

    tm = _round_up(hc * wp, 128)          # flat output columns, lane-dense
    d_max = (kh - 1) * wp + (kw - 1)      # largest static tap shift
    l_flat = _round_up(tm + d_max, 128)   # halo slab length per image

    # ---- wrapper prep: zero-pad + flatten only (no 9x im2col in HBM) ----
    xp = jnp.pad(x, ((0, 0), (0, cin_p - cin),
                     (padding, padding), (padding, padding)))
    x_flat = xp.reshape(n, cin_p, hp * wp)
    x_flat = jnp.pad(x_flat, ((0, 0), (0, 0), (0, l_flat - hp * wp)))
    x_flat = x_flat.astype(jnp.bfloat16)

    # Weight rows ordered (kh, kw, cin) to match the in-kernel tap stacking.
    w_mat = jnp.pad(weight.transpose(0, 2, 3, 1),
                    ((0, cout_p - cout), (0, 0), (0, 0), (0, cin_p - cin)))
    w_mat = w_mat.reshape(cout_p, k_p).astype(jnp.bfloat16)

    gamma_p = jnp.pad(gamma.astype(jnp.float32).reshape(cout, 1),
                      ((0, cout_p - cout), (0, 0)))
    beta_p = jnp.pad(beta.astype(jnp.float32).reshape(cout, 1),
                     ((0, cout_p - cout), (0, 0)))

    # Valid (strided) output positions within the stride-1 flat grid.
    p = jnp.arange(tm)
    r, c = p // wp, p % wp
    valid = ((r % stride == 0) & (r // stride < ho)
             & (c % stride == 0) & (c // stride < wo))
    mask = valid.astype(jnp.float32).reshape(1, tm)

    m_valid = n * ho * wo
    taps = tuple((di, dj) for di in range(kh) for dj in range(kw))

    kernel = functools.partial(
        _fused_kernel, taps=taps, cin_p=cin_p, tm=tm, wp=wp,
        inv_m_valid=1.0 / m_valid)

    flops = 2 * n * tm * k_p * cout_p
    bytes_accessed = (x_flat.size * 2 + w_mat.size * 2
                      + n * cout_p * tm * 4 + tm * 4 + 2 * cout_p * 4)

    out_flat = pl.pallas_call(
        kernel,
        out_shape=jax.ShapeDtypeStruct((n, cout_p, tm), jnp.float32),
        grid=(n,),
        in_specs=[
            pl.BlockSpec((cout_p, k_p), lambda i: (0, 0)),          # weights
            pl.BlockSpec((1, cin_p, l_flat), lambda i: (i, 0, 0)),  # halo slab i
            pl.BlockSpec((1, tm), lambda i: (0, 0)),                # valid mask
            pl.BlockSpec((cout_p, 1), lambda i: (0, 0)),            # gamma
            pl.BlockSpec((cout_p, 1), lambda i: (0, 0)),            # beta
        ],
        out_specs=pl.BlockSpec((n, cout_p, tm), lambda i: (0, 0, 0)),
        scratch_shapes=[pltpu.VMEM((k_p, tm), jnp.bfloat16)],
        compiler_params=pltpu.CompilerParams(
            dimension_semantics=("arbitrary",),   # output block is revisited
            vmem_limit_bytes=32 * 1024 * 1024),   # safe on v5e/v6e/v7x
        cost_estimate=pl.CostEstimate(flops=flops, transcendentals=0,
                                      bytes_accessed=bytes_accessed),
    )(w_mat, x_flat, mask, gamma_p, beta_p)

    # Channel slice + strided gather of the valid flat columns (cheap slices,
    # no transpose: the kernel output is already channel-major).
    out = out_flat[:, :cout, :hc * wp].reshape(n, cout, hc, wp)
    out = out[:, :, ::stride, :(wo - 1) * stride + 1:stride]
    return out


def _reference(x, weight, gamma, beta, *, stride=1, padding=1):
    y = lax.conv_general_dilated(
        x.astype(jnp.float32), weight.astype(jnp.float32),
        window_strides=(stride, stride),
        padding=((padding, padding), (padding, padding)),
        dimension_numbers=("NCHW", "OIHW", "NCHW"),
        precision=lax.Precision.HIGHEST)
    mean = jnp.mean(y, axis=(0, 2, 3), keepdims=True)
    var = jnp.mean((y - mean) ** 2, axis=(0, 2, 3), keepdims=True)
    y = (y - mean) * lax.rsqrt(var + BN_EPS)
    y = y * gamma.reshape(1, -1, 1, 1) + beta.reshape(1, -1, 1, 1)
    return jnp.maximum(y, 0.0)


if __name__ == "__main__":
    # Module config: BasicConv2d(in_channels=4, out_channels=8, kernel_size=3, padding=1)
    N, CIN, H, W = 2, 4, 16, 16
    COUT, KH, KW = 8, 3, 3

    key = jax.random.PRNGKey(0)
    kx, kw_, kg, kb = jax.random.split(key, 4)
    x = jax.random.normal(kx, (N, CIN, H, W), dtype=jnp.float32)
    fan_in = CIN * KH * KW
    weight = jax.random.normal(kw_, (COUT, CIN, KH, KW), dtype=jnp.float32) / jnp.sqrt(fan_in)
    gamma = 1.0 + 0.1 * jax.random.normal(kg, (COUT,), dtype=jnp.float32)
    beta = 0.1 * jax.random.normal(kb, (COUT,), dtype=jnp.float32)

    out = basic_conv2d(x, weight, gamma, beta, stride=1, padding=1)
    out = jax.block_until_ready(out)
    assert out.shape == (N, COUT, H, W), out.shape

    ref = _reference(x, weight, gamma, beta, stride=1, padding=1)
    # bf16 MXU operands with f32 accumulation -> slightly looser tolerance than all-f32.
    err = float(jnp.max(jnp.abs(out - ref)))
    assert jnp.allclose(out, ref, atol=2e-2, rtol=2e-2), err

    print("KERNEL_OK")
</pallas_src>

<mosaic_0001>
module attributes {stable_mosaic.version = 11 : i64} {
  func.func @_fused_kernel(%arg0: i32, %arg1: memref<16x144xbf16, #tpu.memory_space<vmem>>, %arg2: memref<1x16x512xbf16, #tpu.memory_space<vmem>>, %arg3: memref<1x384xf32, #tpu.memory_space<vmem>>, %arg4: memref<16x1xf32, #tpu.memory_space<vmem>>, %arg5: memref<16x1xf32, #tpu.memory_space<vmem>>, %arg6: memref<2x16x384xf32, #tpu.memory_space<vmem>>, %arg7: memref<144x384xbf16, #tpu.memory_space<vmem>>) attributes {dimension_semantics = [#tpu.dimension_semantics<arbitrary>], iteration_bounds = array<i64: 2>, scalar_prefetch = 0 : i64, scratch_operands = 1 : i64, tpu.core_type = #tpu.core_type<tc>, window_params = [{pipeline_mode = #tpu.pipeline_mode<synchronous>, transform_indices = @transform_0, window_bounds = array<i64: 16, 144>}, {transform_indices = @transform_1, window_bounds = array<i64: 1, 16, 512>}, {pipeline_mode = #tpu.pipeline_mode<synchronous>, transform_indices = @transform_2, window_bounds = array<i64: 1, 384>}, {pipeline_mode = #tpu.pipeline_mode<synchronous>, transform_indices = @transform_3, window_bounds = array<i64: 16, 1>}, {pipeline_mode = #tpu.pipeline_mode<synchronous>, transform_indices = @transform_4, window_bounds = array<i64: 16, 1>}, {pipeline_mode = #tpu.pipeline_mode<synchronous>, transform_indices = @transform_5, window_bounds = array<i64: 2, 16, 384>}]} {
    %c0 = arith.constant 0 : index
    %c0_0 = arith.constant 0 : index
    %c0_1 = arith.constant 0 : index
    %0 = vector.load %arg2[%c0, %c0_0, %c0_1] : memref<1x16x512xbf16, #tpu.memory_space<vmem>>, vector<1x16x384xbf16>
    %1 = vector.shape_cast %0 : vector<1x16x384xbf16> to vector<16x384xbf16>
    %c0_2 = arith.constant 0 : index
    %c0_3 = arith.constant 0 : index
    %2 = vector.load %arg7[%c0_2, %c0_3] : memref<144x384xbf16, #tpu.memory_space<vmem>>, vector<16x384xbf16>
    tpu.vector_store %arg7[%c0_2, %c0_3], %1 {strides = array<i32>} : memref<144x384xbf16, #tpu.memory_space<vmem>>, vector<16x384xbf16>,
    %c0_4 = arith.constant 0 : index
    %c0_5 = arith.constant 0 : index
    %c1 = arith.constant 1 : index
    %3 = vector.load %arg2[%c0_4, %c0_5, %c1] : memref<1x16x512xbf16, #tpu.memory_space<vmem>>, vector<1x16x384xbf16>
    %4 = vector.shape_cast %3 : vector<1x16x384xbf16> to vector<16x384xbf16>
    %c16 = arith.constant 16 : index
    %c0_6 = arith.constant 0 : index
    %5 = vector.load %arg7[%c16, %c0_6] : memref<144x384xbf16, #tpu.memory_space<vmem>>, vector<16x384xbf16>
    tpu.vector_store %arg7[%c16, %c0_6], %4 {strides = array<i32>} : memref<144x384xbf16, #tpu.memory_space<vmem>>, vector<16x384xbf16>,
    %c0_7 = arith.constant 0 : index
    %c0_8 = arith.constant 0 : index
    %c2 = arith.constant 2 : index
    %6 = vector.load %arg2[%c0_7, %c0_8, %c2] : memref<1x16x512xbf16, #tpu.memory_space<vmem>>, vector<1x16x384xbf16>
    %7 = vector.shape_cast %6 : vector<1x16x384xbf16> to vector<16x384xbf16>
    %c32 = arith.constant 32 : index
    %c0_9 = arith.constant 0 : index
    %8 = vector.load %arg7[%c32, %c0_9] : memref<144x384xbf16, #tpu.memory_space<vmem>>, vector<16x384xbf16>
    tpu.vector_store %arg7[%c32, %c0_9], %7 {strides = array<i32>} : memref<144x384xbf16, #tpu.memory_space<vmem>>, vector<16x384xbf16>,
    %c0_10 = arith.constant 0 : index
    %c0_11 = arith.constant 0 : index
    %c18 = arith.constant 18 : index
    %9 = vector.load %arg2[%c0_10, %c0_11, %c18] : memref<1x16x512xbf16, #tpu.memory_space<vmem>>, vector<1x16x384xbf16>
    %10 = vector.shape_cast %9 : vector<1x16x384xbf16> to vector<16x384xbf16>
    %c48 = arith.constant 48 : index
    %c0_12 = arith.constant 0 : index
    %11 = vector.load %arg7[%c48, %c0_12] : memref<144x384xbf16, #tpu.memory_space<vmem>>, vector<16x384xbf16>
    tpu.vector_store %arg7[%c48, %c0_12], %10 {strides = array<i32>} : memref<144x384xbf16, #tpu.memory_space<vmem>>, vector<16x384xbf16>,
    %c0_13 = arith.constant 0 : index
    %c0_14 = arith.constant 0 : index
    %c19 = arith.constant 19 : index
    %12 = vector.load %arg2[%c0_13, %c0_14, %c19] : memref<1x16x512xbf16, #tpu.memory_space<vmem>>, vector<1x16x384xbf16>
    %13 = vector.shape_cast %12 : vector<1x16x384xbf16> to vector<16x384xbf16>
    %c64 = arith.constant 64 : index
    %c0_15 = arith.constant 0 : index
    %14 = vector.load %arg7[%c64, %c0_15] : memref<144x384xbf16, #tpu.memory_space<vmem>>, vector<16x384xbf16>
    tpu.vector_store %arg7[%c64, %c0_15], %13 {strides = array<i32>} : memref<144x384xbf16, #tpu.memory_space<vmem>>, vector<16x384xbf16>,
    %c0_16 = arith.constant 0 : index
    %c0_17 = arith.constant 0 : index
    %c20 = arith.constant 20 : index
    %15 = vector.load %arg2[%c0_16, %c0_17, %c20] : memref<1x16x512xbf16, #tpu.memory_space<vmem>>, vector<1x16x384xbf16>
    %16 = vector.shape_cast %15 : vector<1x16x384xbf16> to vector<16x384xbf16>
    %c80 = arith.constant 80 : index
    %c0_18 = arith.constant 0 : index
    %17 = vector.load %arg7[%c80, %c0_18] : memref<144x384xbf16, #tpu.memory_space<vmem>>, vector<16x384xbf16>
    tpu.vector_store %arg7[%c80, %c0_18], %16 {strides = array<i32>} : memref<144x384xbf16, #tpu.memory_space<vmem>>, vector<16x384xbf16>,
    %c0_19 = arith.constant 0 : index
    %c0_20 = arith.constant 0 : index
    %c36 = arith.constant 36 : index
    %18 = vector.load %arg2[%c0_19, %c0_20, %c36] : memref<1x16x512xbf16, #tpu.memory_space<vmem>>, vector<1x16x384xbf16>
    %19 = vector.shape_cast %18 : vector<1x16x384xbf16> to vector<16x384xbf16>
    %c96 = arith.constant 96 : index
    %c0_21 = arith.constant 0 : index
    %20 = vector.load %arg7[%c96, %c0_21] : memref<144x384xbf16, #tpu.memory_space<vmem>>, vector<16x384xbf16>
    tpu.vector_store %arg7[%c96, %c0_21], %19 {strides = array<i32>} : memref<144x384xbf16, #tpu.memory_space<vmem>>, vector<16x384xbf16>,
    %c0_22 = arith.constant 0 : index
    %c0_23 = arith.constant 0 : index
    %c37 = arith.constant 37 : index
    %21 = vector.load %arg2[%c0_22, %c0_23, %c37] : memref<1x16x512xbf16, #tpu.memory_space<vmem>>, vector<1x16x384xbf16>
    %22 = vector.shape_cast %21 : vector<1x16x384xbf16> to vector<16x384xbf16>
    %c112 = arith.constant 112 : index
    %c0_24 = arith.constant 0 : index
    %23 = vector.load %arg7[%c112, %c0_24] : memref<144x384xbf16, #tpu.memory_space<vmem>>, vector<16x384xbf16>
    tpu.vector_store %arg7[%c112, %c0_24], %22 {strides = array<i32>} : memref<144x384xbf16, #tpu.memory_space<vmem>>, vector<16x384xbf16>,
    %c0_25 = arith.constant 0 : index
    %c0_26 = arith.constant 0 : index
    %c38 = arith.constant 38 : index
    %24 = vector.load %arg2[%c0_25, %c0_26, %c38] : memref<1x16x512xbf16, #tpu.memory_space<vmem>>, vector<1x16x384xbf16>
    %25 = vector.shape_cast %24 : vector<1x16x384xbf16> to vector<16x384xbf16>
    %c128 = arith.constant 128 : index
    %c0_27 = arith.constant 0 : index
    %26 = vector.load %arg7[%c128, %c0_27] : memref<144x384xbf16, #tpu.memory_space<vmem>>, vector<16x384xbf16>
    tpu.vector_store %arg7[%c128, %c0_27], %25 {strides = array<i32>} : memref<144x384xbf16, #tpu.memory_space<vmem>>, vector<16x384xbf16>,
    %c0_28 = arith.constant 0 : index
    %c0_29 = arith.constant 0 : index
    %27 = vector.load %arg1[%c0_28, %c0_29] : memref<16x144xbf16, #tpu.memory_space<vmem>>, vector<16x144xbf16>
    %c0_30 = arith.constant 0 : index
    %c0_31 = arith.constant 0 : index
    %28 = vector.load %arg7[%c0_30, %c0_31] : memref<144x384xbf16, #tpu.memory_space<vmem>>, vector<144x384xbf16>
    %cst = arith.constant dense<0.000000e+00> : vector<16x384xf32>
    %29 = tpu.matmul %27, %28, %cst {dimension_numbers = #tpu.dot_dimension_numbers<[1], [0], [0], [1], [0, 0, 1, 1], [], []>} : vector<16x144xbf16>, vector<144x384xbf16>, vector<16x384xf32> -> vector<16x384xf32>
    %30 = arith.index_cast %arg0 : i32 to index
    %c0_32 = arith.constant 0 : index
    %c0_33 = arith.constant 0 : index
    %31 = vector.load %arg6[%30, %c0_32, %c0_33] : memref<2x16x384xf32, #tpu.memory_space<vmem>>, vector<1x16x384xf32>
    %32 = vector.shape_cast %31 : vector<1x16x384xf32> to vector<16x384xf32>
    %33 = vector.shape_cast %29 : vector<16x384xf32> to vector<1x16x384xf32>
    tpu.vector_store %arg6[%30, %c0_32, %c0_33], %33 {strides = array<i32>} : memref<2x16x384xf32, #tpu.memory_space<vmem>>, vector<1x16x384xf32>,
    %c1_i32 = arith.constant 1 : i32
    %34 = arith.cmpi eq, %arg0, %c1_i32 : i32
    %35 = arith.extui %34 : i1 to i32
    %c0_i32 = arith.constant 0 : i32
    %36 = arith.cmpi ne, %35, %c0_i32 : i32
    scf.if %36 {
      %c0_34 = arith.constant 0 : index
      %c0_35 = arith.constant 0 : index
      %c0_36 = arith.constant 0 : index
      %37 = vector.load %arg6[%c0_34, %c0_35, %c0_36] : memref<2x16x384xf32, #tpu.memory_space<vmem>>, vector<2x16x384xf32>
      %c0_37 = arith.constant 0 : index
      %c0_38 = arith.constant 0 : index
      %38 = vector.load %arg3[%c0_37, %c0_38] : memref<1x384xf32, #tpu.memory_space<vmem>>, vector<1x384xf32>
      %39 = vector.shape_cast %38 : vector<1x384xf32> to vector<1x1x384xf32>
      %40 = vector.broadcast %39 : vector<1x1x384xf32> to vector<2x16x384xf32>
      %41 = arith.mulf %37, %40 : vector<2x16x384xf32>
      %cst_39 = arith.constant dense<0.000000e+00> : vector<16x384xf32>
      %42 = vector.multi_reduction <add>, %41, %cst_39 [0] : vector<2x16x384xf32> to vector<16x384xf32>
      %cst_40 = arith.constant dense<0.000000e+00> : vector<16xf32>
      %43 = vector.multi_reduction <add>, %42, %cst_40 [1] : vector<16x384xf32> to vector<16xf32>
      %44 = vector.shape_cast %43 : vector<16xf32> to vector<16x1xf32>
      %cst_41 = arith.constant 0.001953125 : f32
      %45 = vector.broadcast %cst_41 : f32 to vector<16x1xf32>
      %46 = arith.mulf %44, %45 : vector<16x1xf32>
      %47 = vector.shape_cast %46 : vector<16x1xf32> to vector<1x16x1xf32>
      %48 = vector.broadcast %47 : vector<1x16x1xf32> to vector<2x16x384xf32>
      %49 = arith.subf %37, %48 : vector<2x16x384xf32>
      %50 = vector.broadcast %39 : vector<1x1x384xf32> to vector<2x16x384xf32>
      %51 = arith.mulf %49, %50 : vector<2x16x384xf32>
      %52 = arith.mulf %51, %51 : vector<2x16x384xf32>
      %cst_42 = arith.constant dense<0.000000e+00> : vector<16x384xf32>
      %53 = vector.multi_reduction <add>, %52, %cst_42 [0] : vector<2x16x384xf32> to vector<16x384xf32>
      %cst_43 = arith.constant dense<0.000000e+00> : vector<16xf32>
      %54 = vector.multi_reduction <add>, %53, %cst_43 [1] : vector<16x384xf32> to vector<16xf32>
      %55 = vector.shape_cast %54 : vector<16xf32> to vector<16x1xf32>
      %cst_44 = arith.constant 0.001953125 : f32
      %56 = vector.broadcast %cst_44 : f32 to vector<16x1xf32>
      %57 = arith.mulf %55, %56 : vector<16x1xf32>
      %c0_45 = arith.constant 0 : index
      %c0_46 = arith.constant 0 : index
      %58 = vector.load %arg4[%c0_45, %c0_46] : memref<16x1xf32, #tpu.memory_space<vmem>>, vector<16x1xf32>
      %cst_47 = arith.constant 1.000000e-03 : f32
      %59 = vector.broadcast %cst_47 : f32 to vector<16x1xf32>
      %60 = arith.addf %57, %59 : vector<16x1xf32>
      %61 = math.rsqrt %60 : vector<16x1xf32>
      %62 = arith.mulf %58, %61 : vector<16x1xf32>
      %c0_48 = arith.constant 0 : index
      %c0_49 = arith.constant 0 : index
      %63 = vector.load %arg5[%c0_48, %c0_49] : memref<16x1xf32, #tpu.memory_space<vmem>>, vector<16x1xf32>
      %64 = arith.mulf %46, %62 : vector<16x1xf32>
      %65 = arith.subf %63, %64 : vector<16x1xf32>
      %66 = vector.shape_cast %62 : vector<16x1xf32> to vector<1x16x1xf32>
      %67 = vector.broadcast %66 : vector<1x16x1xf32> to vector<2x16x384xf32>
      %68 = arith.mulf %37, %67 : vector<2x16x384xf32>
      %69 = vector.shape_cast %65 : vector<16x1xf32> to vector<1x16x1xf32>
      %70 = vector.broadcast %69 : vector<1x16x1xf32> to vector<2x16x384xf32>
      %71 = arith.addf %68, %70 : vector<2x16x384xf32>
      %cst_50 = arith.constant 0.000000e+00 : f32
      %72 = vector.broadcast %cst_50 : f32 to vector<2x16x384xf32>
      %73 = arith.maximumf %71, %72 : vector<2x16x384xf32>
      %c0_51 = arith.constant 0 : index
      %c0_52 = arith.constant 0 : index
      %c0_53 = arith.constant 0 : index
      %74 = vector.load %arg6[%c0_51, %c0_52, %c0_53] : memref<2x16x384xf32, #tpu.memory_space<vmem>>, vector<2x16x384xf32>
      tpu.vector_store %arg6[%c0_51, %c0_52, %c0_53], %73 {strides = array<i32>} : memref<2x16x384xf32, #tpu.memory_space<vmem>>, vector<2x16x384xf32>,
    } else {
    }
    return
  }
  func.func @transform_0(%arg0: i32) -> (i32, i32) {
    %c0_i32 = arith.constant 0 : i32
    %c0_i32_0 = arith.constant 0 : i32
    %c0_i32_1 = arith.constant 0 : i32
    return %c0_i32, %c0_i32_0 : i32, i32
  }
  func.func @transform_1(%arg0: i32) -> (i32, i32, i32) {
    %c0_i32 = arith.constant 0 : i32
    %c0_i32_0 = arith.constant 0 : i32
    %c0_i32_1 = arith.constant 0 : i32
    return %arg0, %c0_i32, %c0_i32_0 : i32, i32, i32
  }
  func.func @transform_2(%arg0: i32) -> (i32, i32) {
    %c0_i32 = arith.constant 0 : i32
    %c0_i32_0 = arith.constant 0 : i32
    %c0_i32_1 = arith.constant 0 : i32
    return %c0_i32, %c0_i32_0 : i32, i32
  }
  func.func @transform_3(%arg0: i32) -> (i32, i32) {
    %c0_i32 = arith.constant 0 : i32
    %c0_i32_0 = arith.constant 0 : i32
    %c0_i32_1 = arith.constant 0 : i32
    return %c0_i32, %c0_i32_0 : i32, i32
  }
  func.func @transform_4(%arg0: i32) -> (i32, i32) {
    %c0_i32 = arith.constant 0 : i32
    %c0_i32_0 = arith.constant 0 : i32
    %c0_i32_1 = arith.constant 0 : i32
    return %c0_i32, %c0_i32_0 : i32, i32
  }
  func.func @transform_5(%arg0: i32) -> (i32, i32, i32) {
    %c0_i32 = arith.constant 0 : i32
    %c0_i32_0 = arith.constant 0 : i32
    %c0_i32_1 = arith.constant 0 : i32
    %c0_i32_2 = arith.constant 0 : i32
    return %c0_i32, %c0_i32_0, %c0_i32_1 : i32, i32, i32
  }
}

</mosaic_0001>

<bundles_post_ra>
// kernel: basic_conv2d.1
= control target key start
LH: loop header
LB: loop body
LE: loop exit
PB: predicated region body
PF: predicated region fallthrough
CT: control target
= control target key end

     0   :  { %s1031_s18 = smov 0   ;;  %s1264_s0 = inlined_call_operand.vmem [shape: bf16[16,144], index: 0, kind: input, shape index: {}]   ;;  %s1265_s1 = inlined_call_operand.vmem [shape: bf16[2,16,512], index: 1, kind: input, shape index: {}]   ;;  %s1266_s2 = inlined_call_operand.vmem [shape: f32[1,384], index: 2, kind: input, shape index: {}]   ;;  %s1267_s3 = inlined_call_operand.vmem [shape: f32[16,1], index: 3, kind: input, shape index: {}]   ;;  %s1268_s4 = inlined_call_operand.vmem [shape: f32[16,1], index: 4, kind: input, shape index: {}]   ;;  %s1269_s5 = inlined_call_operand.vmem [shape: f32[2,16,384], index: 5, kind: output, shape index: {}]  }
   0x1 LB: > { %s1037_s19 = sadd.s32 4294967295, %s989_s18   ;;  %p901_p0 = scmp.ge.s32.totalorder %s989_s18, 1  ;;  %s989_s18 = sphi %s1031_s18, %s15_s18  }
   0x2   : > { %p182_p1 = scmp.lt.s32.totalorder %s989_s18, 3 }
   0x4   : > { %p183_p2 = pnand %p901_p0, %p182_p1 }
   0x5   : > { %p205_p3 = scmp.lt.s32.totalorder (!%p183_p2), %s1037_s19, 1  ;;  %v991_v0 = vmov (!%p183_p2), 0   ;;  %s992_s25 = smov (!%p183_p2), 127   ;;  %v976_v6 = vld [vmem:[%s1264_s0 + $0x4] ss:$8 sps:$4 sm:$0xff] (!%p183_p2)   ;;  %vm576_vm0 = vcmask (!%p183_p2), 130048  }
   0x6   : > { %186 = sbr.rel (%p183_p2) target bundleno = 893 (0x37d), region = 40  ;;  %623 = vmatprep.subr.bf16.mxu1 (!%p183_p2), %v991_v0  ;;  %s993_s26 = smov (!%p183_p2), 126   ;;  %941 = vmatprep.mubr.msk.bf16.mxu0 (!%p183_p2), %vm576_vm0, %v976_v6  ;;  %vm262_vm1 = vcmask (!%p183_p2), 1039360   ;;  %vm300_vm2 = vcmask (!%p183_p2), 1031168   ;;  %vm338_vm3 = vcmask (!%p183_p2), 900096   ;;  %vm376_vm4 = vcmask (!%p183_p2), 891904  }
   0x7   : > { %s994_s27 = smov (!%p183_p2), 110   ;;  %s995_s28 = smov (!%p183_p2), 109   ;;  %942 = vmatprep.mubr.msk.bf16.mxu1 (!%p183_p2), %vm576_vm0, %v976_v6  ;;  %vm414_vm5 = vcmask (!%p183_p2), 883712   ;;  %vm452_vm6 = vcmask (!%p183_p2), 752640   ;;  %vm490_vm7 = vcmask (!%p183_p2), 744448   ;;  %vm528_vm8 = vcmask (!%p183_p2), 736256  }
   0x8   : > { %s996_s29 = smov (!%p183_p2), 108   ;;  %s997_s30 = smov (!%p183_p2), 92   ;;  %v974_v62 = vld [vmem:[%s1264_s0] ss:$8 sps:$4 sm:$0xff] (!%p183_p2)  }
   0x9   : > { %s998_s6 = smov (!%p183_p2), 91   ;;  %s999_s9 = smov (!%p183_p2), 90  }
   0xa   : > { %s948_s12 = smul.u32 (!%p183_p2), 48, %s1037_s19  ;;  %p944_p4 = scmp.ne.s32.totalorder (!%p183_p2), %s1037_s19, 1 }
   0xc   : > { %s666_s15 = scalar_lea.vmem (!%p183_p2), %s1269_s5, %s948_s12 }
   0xd   : > { %s206_s20 = scalar_select %p205_p3, %s1037_s19, 1 }
   0xf   : > { %s947_s21 = sshll.u32 %s206_s20, 5 }
  0x10   : > { %s209_s24 = scalar_lea.vmem %s1265_s1, %s947_s21 }
  0x11   : > { %v967_v1 = vld [vmem:[%s209_s24 + $0x4] ss:$16 sps:$4 sm:$0xff]   ;;  %v969_v2 = vld [vmem:[%s209_s24] ss:$16 sps:$4 sm:$0xff]   ;;  %v970_v3 = vld [vmem:[%s209_s24 + $0x8] ss:$16 sps:$4 sm:$0xff]  }
  0x12   : > { %256 = vrot.lane.b32.xlu0 %v967_v1, %s992_s25  ;;  %580 = vmatprep.subr.bf16.mxu0 %v967_v1  ;;  %v972_v4 = vld [vmem:[%s209_s24 + $0xc] ss:$16 sps:$4 sm:$0xff]   ;;  %v973_v5 = vld [vmem:[%s209_s24 + $0x8] ss:$16 sps:$4 sm:$0xff]  }
  0x13   : > { %254 = vrot.lane.b32.xlu1 %v969_v2, %s992_s25  ;;  %581 = vmatpush1.bf16.msra.mxu0 %v969_v2 }
  0x14   : > { %624 = vmatpush1.bf16.msra.mxu1 %v973_v5 }
  0x15   : > { %625 = vmatprep.subr.bf16.mxu1 %v991_v0 }
  0x16   : > { %258 = vrot.lane.b32.xlu0 %v970_v3, %s992_s25 }
  0x17   : > { %260 = vrot.lane.b32.xlu1 %v972_v4, %s992_s25 }
  0x1a   : > { %294 = vrot.lane.b32.xlu0 %v967_v1, %s993_s26 }
  0x1b   : > { %296 = vrot.lane.b32.xlu1 %v970_v3, %s993_s26 }
  0x1e   : > { %292 = vrot.lane.b32.xlu0 %v969_v2, %s993_s26 }
  0x1f   : > { %298 = vrot.lane.b32.xlu1 %v972_v4, %s993_s26 }
  0x22   : > { %332 = vrot.lane.b32.xlu0 %v967_v1, %s994_s27 }
  0x23   : > { %334 = vrot.lane.b32.xlu1 %v970_v3, %s994_s27 }
  0x26   : > { %330 = vrot.lane.b32.xlu0 %v969_v2, %s994_s27 }
  0x27   : > { %336 = vrot.lane.b32.xlu1 %v972_v4, %s994_s27 }
  0x2a   : > { %370 = vrot.lane.b32.xlu0 %v967_v1, %s995_s28 }
  0x2b   : > { %372 = vrot.lane.b32.xlu1 %v970_v3, %s995_s28 }
  0x2e   : > { %368 = vrot.lane.b32.xlu0 %v969_v2, %s995_s28 }
  0x2f   : > { %374 = vrot.lane.b32.xlu1 %v972_v4, %s995_s28 }
  0x32   : > { %408 = vrot.lane.b32.xlu0 %v967_v1, %s996_s29 }
  0x33   : > { %410 = vrot.lane.b32.xlu1 %v970_v3, %s996_s29 }
  0x36   : > { %406 = vrot.lane.b32.xlu0 %v969_v2, %s996_s29 }
  0x37   : > { %412 = vrot.lane.b32.xlu1 %v972_v4, %s996_s29 }
  0x3a   : > { %446 = vrot.lane.b32.xlu0 %v967_v1, %s997_s30 }
  0x3b   : > { %448 = vrot.lane.b32.xlu1 %v970_v3, %s997_s30 }
  0x3e   : > { %444 = vrot.lane.b32.xlu0 %v969_v2, %s997_s30 }
  0x3f   : > { %450 = vrot.lane.b32.xlu1 %v972_v4, %s997_s30 }
  0x42   : > { %484 = vrot.lane.b32.xlu0 %v967_v1, %s998_s6 }
  0x43   : > { %486 = vrot.lane.b32.xlu1 %v970_v3, %s998_s6 }
  0x46   : > { %482 = vrot.lane.b32.xlu0 %v969_v2, %s998_s6 }
  0x47   : > { %488 = vrot.lane.b32.xlu1 %v972_v4, %s998_s6 }
  0x4a   : > { %522 = vrot.lane.b32.xlu0 %v967_v1, %s999_s9 }
  0x4b   : > { %524 = vrot.lane.b32.xlu1 %v970_v3, %s999_s9 }
  0x4e   : > { %520 = vrot.lane.b32.xlu0 %v969_v2, %s999_s9 }
  0x4f   : > { %526 = vrot.lane.b32.xlu1 %v972_v4, %s999_s9 }
  0x84   : > { %v257_v7 = vpop.permute.xlu0 %256 }
  0x85   : > { %v255_v8 = vpop.permute.xlu1 %254 }
  0x86   : > { %v263_v13 = vsel %vm262_vm1, %v255_v8, %v257_v7  ;;  %v691_v8 = vlaneseq (!%p944_p4) }
  0x88   : > { %v259_v9 = vpop.permute.xlu0 %258 }
  0x89   : > { %v261_v10 = vpop.permute.xlu1 %260  ;;  %v264_v11 = vsel %vm262_vm1, %v257_v7, %v259_v9 }
  0x8a   : > { %582 = vmatprep.subr.bf16.mxu0 %v264_v11  ;;  %v265_v12 = vsel %vm262_vm1, %v259_v9, %v261_v10  ;;  %v692_v9 = vshrl.u32 (!%p944_p4), %v691_v8, 7  ;;  %v689_v10 = vld [vmem:[%s1266_s2] sm:$0x7] (!%p944_p4) }
  0x8b   : > { %626 = vmatpush1.bf16.msra.mxu1 %v265_v12  ;;  %583 = vmatpush1.bf16.msra.mxu0 %v263_v13 }
  0x8c   : > { %v295_v14 = vpop.permute.xlu0 %294  ;;  %627 = vmatprep.subr.bf16.mxu1 %v991_v0  ;;  %v693_v13 = vsub.s32 (!%p944_p4), 0, %v692_v9 }
  0x8d   : > { %v297_v15 = vpop.permute.xlu1 %296 }
  0x8e   : > { %v302_v16 = vsel %vm300_vm2, %v295_v14, %v297_v15 }
  0x8f   : > { %584 = vmatprep.subr.bf16.mxu0 %v302_v16 }
  0x90   : > { %v293_v17 = vpop.permute.xlu0 %292 }
  0x91   : > { %v299_v18 = vpop.permute.xlu1 %298  ;;  %v301_v19 = vsel %vm300_vm2, %v293_v17, %v295_v14  ;;  %v697_v14 = vsub.s32 (!%p944_p4), 1, %v692_v9 }
  0x92   : > { %585 = vmatpush1.bf16.msra.mxu0 %v301_v19  ;;  %v303_v20 = vsel %vm300_vm2, %v297_v15, %v299_v18  ;;  %v701_v15 = vsub.s32 (!%p944_p4), 2, %v692_v9 }
  0x93   : > { %628 = vmatpush1.bf16.msra.mxu1 %v303_v20  ;;  %v1099_v20 = vrot.slane (!%p944_p4), %v689_v10, %v693_v13 }
  0x94   : > { %v333_v21 = vpop.permute.xlu0 %332  ;;  %629 = vmatprep.subr.bf16.mxu1 %v991_v0 }
  0x95   : > { %v335_v22 = vpop.permute.xlu1 %334 }
  0x96   : > { %v340_v23 = vsel %vm338_vm3, %v333_v21, %v335_v22 }
  0x97   : > { %586 = vmatprep.subr.bf16.mxu0 %v340_v23 }
  0x98   : > { %v331_v24 = vpop.permute.xlu0 %330 }
  0x99   : > { %v337_v25 = vpop.permute.xlu1 %336  ;;  %v339_v26 = vsel %vm338_vm3, %v331_v24, %v333_v21  ;;  %v1101_v21 = vrot.slane (!%p944_p4), %v689_v10, %v697_v14 }
  0x9a   : > { %587 = vmatpush1.bf16.msra.mxu0 %v339_v26  ;;  %v341_v27 = vsel %vm338_vm3, %v335_v22, %v337_v25  ;;  %v1103_v22 = vrot.slane (!%p944_p4), %v689_v10, %v701_v15 }
  0x9b   : > { %630 = vmatpush1.bf16.msra.mxu1 %v341_v27 }
  0x9c   : > { %v371_v28 = vpop.permute.xlu0 %370  ;;  %631 = vmatprep.subr.bf16.mxu1 %v991_v0 }
  0x9d   : > { %v373_v29 = vpop.permute.xlu1 %372 }
  0x9e   : > { %v378_v30 = vsel %vm376_vm4, %v371_v28, %v373_v29 }
  0x9f   : > { %588 = vmatprep.subr.bf16.mxu0 %v378_v30 }
  0xa0   : > { %v369_v31 = vpop.permute.xlu0 %368 }
  0xa1   : > { %v375_v32 = vpop.permute.xlu1 %374  ;;  %v377_v33 = vsel %vm376_vm4, %v369_v31, %v371_v28 }
  0xa2   : > { %589 = vmatpush1.bf16.msra.mxu0 %v377_v33  ;;  %v379_v34 = vsel %vm376_vm4, %v373_v29, %v375_v32 }
  0xa3   : > { %632 = vmatpush1.bf16.msra.mxu1 %v379_v34 }
  0xa4   : > { %v409_v35 = vpop.permute.xlu0 %408  ;;  %633 = vmatprep.subr.bf16.mxu1 %v991_v0 }
  0xa5   : > { %v411_v36 = vpop.permute.xlu1 %410 }
  0xa6   : > { %v416_v37 = vsel %vm414_vm5, %v409_v35, %v411_v36 }
  0xa7   : > { %590 = vmatprep.subr.bf16.mxu0 %v416_v37 }
  0xa8   : > { %v407_v38 = vpop.permute.xlu0 %406 }
  0xa9   : > { %v413_v39 = vpop.permute.xlu1 %412  ;;  %v415_v40 = vsel %vm414_vm5, %v407_v38, %v409_v35 }
  0xaa   : > { %591 = vmatpush1.bf16.msra.mxu0 %v415_v40  ;;  %v417_v41 = vsel %vm414_vm5, %v411_v36, %v413_v39 }
  0xab   : > { %634 = vmatpush1.bf16.msra.mxu1 %v417_v41 }
  0xac   : > { %v447_v42 = vpop.permute.xlu0 %446  ;;  %635 = vmatprep.subr.bf16.mxu1 %v991_v0 }
  0xad   : > { %v449_v43 = vpop.permute.xlu1 %448 }
  0xae   : > { %v454_v44 = vsel %vm452_vm6, %v447_v42, %v449_v43 }
  0xaf   : > { %592 = vmatprep.subr.bf16.mxu0 %v454_v44 }
  0xb0   : > { %v445_v45 = vpop.permute.xlu0 %444 }
  0xb1   : > { %v451_v46 = vpop.permute.xlu1 %450  ;;  %v453_v47 = vsel %vm452_vm6, %v445_v45, %v447_v42 }
  0xb2   : > { %593 = vmatpush1.bf16.msra.mxu0 %v453_v47  ;;  %v455_v48 = vsel %vm452_vm6, %v449_v43, %v451_v46 }
  0xb3   : > { %636 = vmatpush1.bf16.msra.mxu1 %v455_v48 }
  0xb4   : > { %v485_v49 = vpop.permute.xlu0 %484  ;;  %637 = vmatprep.subr.bf16.mxu1 %v991_v0 }
  0xb5   : > { %v487_v50 = vpop.permute.xlu1 %486 }
  0xb6   : > { %v492_v51 = vsel %vm490_vm7, %v485_v49, %v487_v50 }
  0xb7   : > { %594 = vmatprep.subr.bf16.mxu0 %v492_v51 }
  0xb8   : > { %v483_v52 = vpop.permute.xlu0 %482 }
  0xb9   : > { %v489_v53 = vpop.permute.xlu1 %488  ;;  %v491_v54 = vsel %vm490_vm7, %v483_v52, %v485_v49 }
  0xba   : > { %595 = vmatpush1.bf16.msra.mxu0 %v491_v54  ;;  %v493_v55 = vsel %vm490_vm7, %v487_v50, %v489_v53 }
  0xbb   : > { %638 = vmatpush1.bf16.msra.mxu1 %v493_v55 }
  0xbc   : > { %v523_v56 = vpop.permute.xlu0 %522  ;;  %639 = vmatprep.subr.bf16.mxu1 %v991_v0 }
  0xbd   : > { %v525_v57 = vpop.permute.xlu1 %524 }
  0xbe   : > { %v530_v58 = vsel %vm528_vm8, %v523_v56, %v525_v57 }
  0xbf   : > { %596 = vmatprep.subr.bf16.mxu0 %v530_v58 }
  0xc0   : > { %v521_v59 = vpop.permute.xlu0 %520 }
  0xc1   : > { %v527_v60 = vpop.permute.xlu1 %526  ;;  %v529_v61 = vsel %vm528_vm8, %v521_v59, %v523_v56 }
  0xc2   : > { %597 = vmatpush1.bf16.msra.mxu0 %v529_v61  ;;  %v531_v63 = vsel %vm528_vm8, %v525_v57, %v527_v60 }
  0xc3   : > { %640 = vmatpush1.bf16.msra.mxu1 %v531_v63 }
  0xc5   : > { %613 = vmatmul.mubr.bf16.vlgmr.msra.gmra.mrb[0].mxu0 %v974_v62 }
  0xc6   : > { %656 = vmatmul.mubr.bf16.vlgmr.msra.gmra.mrb[0].mxu1 %v974_v62 }
 0x196   : > { %676 = sbr.rel (%p944_p4) target bundleno = 893 (0x37d), region = 44 }
 0x198   : > { %v614_v0 = vpop.f32.mrb[0].mxu0 }
 0x199   : > { %667 = vst [vmem:[%s666_s15] sm:$0xff] %v614_v0  ;;  %v657_v1 = vpop.f32.mrb[0].mxu1  ;;  %v616_v2 = vpop.f32.mrb[1].mxu0 }
 0x19a   : > { %669 = vst [vmem:[%s666_s15 + $0x10] sm:$0xff] %v657_v1  ;;  %668 = vst [vmem:[%s666_s15 + $0x8] sm:$0xff] %v616_v2  ;;  %v659_v3 = vpop.f32.mrb[1].mxu1  ;;  %v618_v4 = vpop.f32.mrb[2].mxu0 }
 0x19b   : > { %670 = vst [vmem:[%s666_s15 + $0x18] sm:$0xff] %v618_v4  ;;  %v660_v5 = vpop.f32.mrb[2].mxu1  ;;  %v620_v6 = vpop.f32.mrb[3].mxu0 }
 0x19c   : > { %672 = vst [vmem:[%s666_s15 + $0x28] sm:$0xff] %v660_v5  ;;  %671 = vst [vmem:[%s666_s15 + $0x20] sm:$0xff] %v620_v6  ;;  %v662_v7 = vpop.f32.mrb[3].mxu1 }
 0x1a3   : > { %v1072_v11 = vld [vmem:[%s1269_s5] sm:$0xff]  ;;  %v1077_v12 = vld [vmem:[%s1269_s5 + $0x8] sm:$0xff]  ;;  %v1082_v16 = vld [vmem:[%s1269_s5 + $0x10] sm:$0xff] }
 0x1a4   : > { %v1087_v17 = vld [vmem:[%s1269_s5 + $0x30] sm:$0xff]  ;;  %v1092_v18 = vld [vmem:[%s1269_s5 + $0x38] sm:$0xff]  ;;  %v1097_v19 = vld [vmem:[%s1269_s5 + $0x40] sm:$0xff]  ;;  %v706_v28 = vmul.f32 %v1099_v20, %v1072_v11  ;;  %v707_v29 = vmul.f32 %v1101_v21, %v1077_v12  ;;  %v708_v30 = vmul.f32 %v1103_v22, %v1082_v16 }
 0x1a5   : > { %v1108_v23 = vld [vmem:[%s1269_s5 + $0x18] sm:$0xff]  ;;  %v1113_v24 = vld [vmem:[%s1269_s5 + $0x20] sm:$0xff]  ;;  %v1118_v25 = vld [vmem:[%s1269_s5 + $0x28] sm:$0xff]  ;;  %v712_v31 = vmul.f32 %v1099_v20, %v1087_v17  ;;  %v713_v33 = vmul.f32 %v1101_v21, %v1092_v18  ;;  %v714_v34 = vmul.f32 %v1103_v22, %v1097_v19 }
 0x1a6   : > { %v1123_v26 = vld [vmem:[%s1269_s5 + $0x48] sm:$0xff]  ;;  %v1128_v27 = vld [vmem:[%s1269_s5 + $0x50] sm:$0xff]  ;;  %v1141_v32 = vld [vmem:[%s1269_s5 + $0x58] sm:$0xff]  ;;  %v709_v35 = vmul.f32 %v1099_v20, %v1108_v23  ;;  %v710_v36 = vmul.f32 %v1101_v21, %v1113_v24  ;;  %v711_v38 = vmul.f32 %v1103_v22, %v1118_v25 }
 0x1a7   : > { %v718_v37 = vadd.f32 %v712_v31, %v706_v28  ;;  %v715_v39 = vmul.f32 %v1099_v20, %v1123_v26  ;;  %v716_v40 = vmul.f32 %v1101_v21, %v1128_v27  ;;  %v719_v41 = vadd.f32 %v713_v33, %v707_v29 }
 0x1a8   : > { %v720_v42 = vadd.f32 %v714_v34, %v708_v30  ;;  %v717_v43 = vmul.f32 %v1103_v22, %v1141_v32 }
 0x1a9   : > { %v721_v44 = vadd.f32 %v715_v39, %v709_v35  ;;  %v722_v45 = vadd.f32 %v716_v40, %v710_v36  ;;  %v724_v46 = vadd.f32 %v719_v41, %v718_v37 }
 0x1aa   : > { %v723_v47 = vadd.f32 %v717_v43, %v711_v38 }
 0x1ab   : > { %v728_v48 = vadd.f32 %v722_v45, %v721_v44  ;;  %v725_v49 = vadd.f32 %v724_v46, %v720_v42 }
 0x1ad   : > { %726 = vadd.xlane.f32.xlu0 %v725_v49  ;;  %v729_v50 = vadd.f32 %v728_v48, %v723_v47 }
 0x1b1   : > { %730 = vadd.xlane.f32.xlu0 %v729_v50 }
 0x23a   : > { %v727_v51 = vpop.xlane.xlu0 %726 }
 0x23b   : > { %v1159_v52 = vmul.f32 0.001953125, %v727_v51 }
 0x23d   : > { %v734_v53 = vsub.f32 %v1072_v11, %v1159_v52  ;;  %v735_v54 = vsub.f32 %v1077_v12, %v1159_v52  ;;  %v736_v55 = vsub.f32 %v1082_v16, %v1159_v52  ;;  %v740_v56 = vsub.f32 %v1087_v17, %v1159_v52 }
 0x23e   : > { %v731_v57 = vpop.xlane.xlu0 %730  ;;  %v741_v58 = vsub.f32 %v1092_v18, %v1159_v52  ;;  %v742_v59 = vsub.f32 %v1097_v19, %v1159_v52 }
 0x23f   : > { %v1173_v60 = vmul.f32 0.001953125, %v731_v57  ;;  %v746_v61 = vmul.f32 %v734_v53, %v1099_v20  ;;  %v747_v62 = vmul.f32 %v735_v54, %v1101_v21  ;;  %v748_v63 = vmul.f32 %v736_v55, %v1103_v22  ;;  %v786_v57 = vld [vmem:[%s1267_s3] sm:$0xff] }
 0x240   : > { %v752_v0 = vmul.f32 %v740_v56, %v1099_v20  ;;  %v753_v1 = vmul.f32 %v741_v58, %v1101_v21  ;;  %v754_v2 = vmul.f32 %v742_v59, %v1103_v22 }
 0x241   : > { %v758_v3 = vmul.f32 %v746_v61, %v746_v61  ;;  %v759_v4 = vmul.f32 %v747_v62, %v747_v62  ;;  %v760_v5 = vmul.f32 %v748_v63, %v748_v63  ;;  %v737_v6 = vsub.f32 %v1108_v23, %v1173_v60  ;;  %v787_v61 = vld [vmem:[%s1267_s3 + $0x8] sm:$0xff] }
 0x242   : > { %v764_v7 = vmul.f32 %v752_v0, %v752_v0  ;;  %v765_v8 = vmul.f32 %v753_v1, %v753_v1  ;;  %v766_v9 = vmul.f32 %v754_v2, %v754_v2  ;;  %v738_v10 = vsub.f32 %v1113_v24, %v1173_v60  ;;  %v794_v1 = vld [vmem:[%s1268_s4] sm:$0xff] }
 0x243   : > { %v739_v13 = vsub.f32 %v1118_v25, %v1173_v60  ;;  %v743_v14 = vsub.f32 %v1123_v26, %v1173_v60  ;;  %v744_v15 = vsub.f32 %v1128_v27, %v1173_v60  ;;  %v745_v28 = vsub.f32 %v1141_v32, %v1173_v60 }
 0x244   : > { %v770_v29 = vadd.f32 %v764_v7, %v758_v3  ;;  %v771_v30 = vadd.f32 %v765_v8, %v759_v4  ;;  %v749_v31 = vmul.f32 %v737_v6, %v1099_v20  ;;  %v750_v33 = vmul.f32 %v738_v10, %v1101_v21  ;;  %v795_v4 = vld [vmem:[%s1268_s4 + $0x8] sm:$0xff] }
 0x245   : > { %v751_v34 = vmul.f32 %v739_v13, %v1103_v22  ;;  %v755_v35 = vmul.f32 %v743_v14, %v1099_v20  ;;  %v756_v36 = vmul.f32 %v744_v15, %v1101_v21  ;;  %v772_v37 = vadd.f32 %v766_v9, %v760_v5 }
 0x246   : > { %v776_v38 = vadd.f32 %v771_v30, %v770_v29  ;;  %v757_v39 = vmul.f32 %v745_v28, %v1103_v22  ;;  %v761_v40 = vmul.f32 %v749_v31, %v749_v31  ;;  %v762_v41 = vmul.f32 %v750_v33, %v750_v33 }
 0x247   : > { %v763_v42 = vmul.f32 %v751_v34, %v751_v34  ;;  %v767_v43 = vmul.f32 %v755_v35, %v755_v35  ;;  %v768_v44 = vmul.f32 %v756_v36, %v756_v36  ;;  %v1000_v20 = vmov 0  }
 0x248   : > { %v777_v45 = vadd.f32 %v776_v38, %v772_v37  ;;  %v769_v46 = vmul.f32 %v757_v39, %v757_v39  ;;  %977 = vset.pattern.permute.xlu0 %v1000_v20  ;;  %978 = vset.pattern.permute.xlu1 %v1000_v20 }
 0x249   : > { %v773_v47 = vadd.f32 %v767_v43, %v761_v40  ;;  %v774_v48 = vadd.f32 %v768_v44, %v762_v41 }
 0x24a   : > { %778 = vadd.xlane.f32.xlu1 %v777_v45  ;;  %v775_v49 = vadd.f32 %v769_v46, %v763_v42 }
 0x24b   : > { %v780_v50 = vadd.f32 %v774_v48, %v773_v47 }
 0x24d   : > { %v781_v51 = vadd.f32 %v780_v50, %v775_v49 }
 0x24f   : > { %782 = vadd.xlane.f32.xlu1 %v781_v51 }
 0x2d7   : > { %v779_v21 = vpop.xlane.xlu1 %778 }
 0x2d8   : > { %v784_v53 = vmul.f32 0.001953125, %v779_v21 }
 0x2da   : > { %v788_v22 = vadd.f32 0.001, %v784_v53 }
 0x2dc   : > { %979 = vrsqrt.f32 %v788_v22  ;;  %v783_v54 = vpop.xlane.xlu1 %782 }
 0x2dd   : > { %v785_v55 = vmul.f32 0.001953125, %v783_v54 }
 0x2df   : > { %v789_v56 = vadd.f32 0.001, %v785_v55 }
 0x2e1   : > { %981 = vrsqrt.f32 %v789_v56 }
 0x2e6   : > { %v980_v58 = vpop.eup %979 }
 0x2e7   : > { %v792_v59 = vmul.f32 %v980_v58, %v786_v57 }
 0x2e9   : > { %802 = vperm.xlu0 %977, %v792_v59   ;;  %v796_v0 = vmul.f32 %v792_v59, %v1159_v52 }
 0x2eb   : > { %v982_v62 = vpop.eup %981  ;;  %v798_v2 = vsub.f32 %v794_v1, %v796_v0 }
 0x2ec   : > { %v793_v63 = vmul.f32 %v982_v62, %v787_v61 }
 0x2ee   : > { %807 = vperm.xlu1 %978, %v793_v63   ;;  %v797_v3 = vmul.f32 %v793_v63, %v1173_v60 }
 0x2f0   : > { %v799_v5 = vsub.f32 %v795_v4, %v797_v3 }
 0x2f2   : > { %824 = vperm.xlu1 %978, %v798_v2  }
 0x2f6   : > { %829 = vperm.xlu1 %978, %v799_v5  }
 0x368   : > { %v803_v6 = vpop.permute.xlu0 %802 }
 0x369   : > { %v810_v8 = vmul.f32 %v803_v6, %v1072_v11  ;;  %v811_v52 = vmul.f32 %v803_v6, %v1077_v12  ;;  %v812_v9 = vmul.f32 %v803_v6, %v1082_v16  ;;  %v816_v10 = vmul.f32 %v803_v6, %v1087_v17 }
 0x36a   : > { %v817_v13 = vmul.f32 %v803_v6, %v1092_v18  ;;  %v818_v60 = vmul.f32 %v803_v6, %v1097_v19 }
 0x36d   : > { %v808_v7 = vpop.permute.xlu1 %807 }
 0x36e   : > { %v813_v15 = vmul.f32 %v808_v7, %v1108_v23  ;;  %v814_v28 = vmul.f32 %v808_v7, %v1113_v24  ;;  %v815_v12 = vmul.f32 %v808_v7, %v1118_v25  ;;  %v819_v16 = vmul.f32 %v808_v7, %v1123_v26 }
 0x36f   : > { %v820_v23 = vmul.f32 %v808_v7, %v1128_v27  ;;  %v821_v24 = vmul.f32 %v808_v7, %v1141_v32 }
 0x371   : > { %v825_v14 = vpop.permute.xlu1 %824 }
 0x372   : > { %v832_v29 = vadd.f32 %v825_v14, %v810_v8  ;;  %v833_v30 = vadd.f32 %v825_v14, %v811_v52  ;;  %v834_v31 = vadd.f32 %v825_v14, %v812_v9  ;;  %v838_v33 = vadd.f32 %v825_v14, %v816_v10 }
 0x373   : > { %v839_v11 = vadd.f32 %v825_v14, %v817_v13  ;;  %v840_v34 = vadd.f32 %v825_v14, %v818_v60 }
 0x374   : > { %v844_v17 = vmax.f32 %v832_v29, 0.0  ;;  %v845_v35 = vmax.f32 %v833_v30, 0.0  ;;  %v846_v18 = vmax.f32 %v834_v31, 0.0  ;;  %v850_v36 = vmax.f32 %v838_v33, 0.0 }
 0x375   : > { %v851_v19 = vmax.f32 %v839_v11, 0.0  ;;  %v852_v37 = vmax.f32 %v840_v34, 0.0  ;;  %v830_v38 = vpop.permute.xlu1 %829 }
 0x376   : > { %856 = vst [vmem:[%s1269_s5] sm:$0xff] %v844_v17  ;;  %857 = vst [vmem:[%s1269_s5 + $0x8] sm:$0xff] %v845_v35  ;;  %v835_v25 = vadd.f32 %v830_v38, %v813_v15  ;;  %v836_v26 = vadd.f32 %v830_v38, %v814_v28  ;;  %v837_v27 = vadd.f32 %v830_v38, %v815_v12 }
 0x377   : > { %858 = vst [vmem:[%s1269_s5 + $0x10] sm:$0xff] %v846_v18  ;;  %862 = vst [vmem:[%s1269_s5 + $0x30] sm:$0xff] %v850_v36  ;;  %v841_v32 = vadd.f32 %v830_v38, %v819_v16  ;;  %v842_v39 = vadd.f32 %v830_v38, %v820_v23  ;;  %v843_v40 = vadd.f32 %v830_v38, %v821_v24 }
 0x378   : > { %863 = vst [vmem:[%s1269_s5 + $0x38] sm:$0xff] %v851_v19  ;;  %864 = vst [vmem:[%s1269_s5 + $0x40] sm:$0xff] %v852_v37  ;;  %v847_v41 = vmax.f32 %v835_v25, 0.0  ;;  %v848_v42 = vmax.f32 %v836_v26, 0.0  ;;  %v849_v43 = vmax.f32 %v837_v27, 0.0 }
 0x379   : > { %v853_v44 = vmax.f32 %v841_v32, 0.0  ;;  %v854_v45 = vmax.f32 %v842_v39, 0.0  ;;  %v855_v46 = vmax.f32 %v843_v40, 0.0 }
 0x37a   : > { %859 = vst [vmem:[%s1269_s5 + $0x18] sm:$0xff] %v847_v41  ;;  %860 = vst [vmem:[%s1269_s5 + $0x20] sm:$0xff] %v848_v42 }
 0x37b   : > { %861 = vst [vmem:[%s1269_s5 + $0x28] sm:$0xff] %v849_v43  ;;  %865 = vst [vmem:[%s1269_s5 + $0x48] sm:$0xff] %v853_v44 }
 0x37c   : > { %866 = vst [vmem:[%s1269_s5 + $0x50] sm:$0xff] %v854_v45  ;;  %867 = vst [vmem:[%s1269_s5 + $0x58] sm:$0xff] %v855_v46 }
 0x37d PF: > { %s15_s18 = sadd.s32 1, %s989_s18  }
 0x37e   : > { %p12_p5 = scmp.ge.s32.totalorder %s15_s18, 4  }
 0x380   :  { %14 = sbr.rel (!%p12_p5) target bundleno = 1 (0x1), region = 71 }

</bundles_post_ra>
